<compile_context>
chip_gen: v7x
topology: tpu7x:2x2x1
jax: 0.10.0
libtpu: 0.0.40
codegen_flags: <defaults>
</compile_context>

<pallas_src>
import functools

import jax
import jax.numpy as jnp
from jax.experimental import pallas as pl
from jax.experimental.pallas import tpu as pltpu

INPUT_SIZE = 28 * 28   # 784
HIDDEN = 50
NUM_CLASSES = 10

HIDDEN_PAD = 128       # 50 -> 128 (zero-padded columns; lane-dense hidden)
OUT_PAD = 128          # 10 -> 128 (zero-padded columns; lane-dense stores)

TB_MAX = 1024          # batch tile: big enough to amortize ~0.35us/step grid
                       # overhead, small enough for v7x's 64 MiB VMEM
                       # (2 x 1024x784x2B (x) + 2 x 1024x128x4B (out)
                       #  + ~0.3 MiB weights  ~ 4.4 MiB total)


def _round_up(x, m):
    return ((x + m - 1) // m) * m


def mlp_kernel(x_ref, w1_ref, b1_ref, w2_ref, b2_ref, o_ref):
    # fc1 on the MXU (bf16 operands, f32 accumulation); bias + ReLU on the VPU.
    h = jnp.dot(x_ref[...], w1_ref[...], preferred_element_type=jnp.float32)
    h = jnp.maximum(h + b1_ref[...], 0.0)            # [TB,128] + [1,128]
    # fc2 in f32 (tiny: [TB,128]x[128,128]); padded columns stay exactly zero.
    y = jnp.dot(h, w2_ref[...], preferred_element_type=jnp.float32)
    o_ref[...] = (y + b2_ref[...]).astype(o_ref.dtype)


def _prepare_params(w1, b1, w2, b2):
    """Zero-pad canonical [784,50]/[50,10] params to the lane-dense padded layout."""
    w1p = jnp.zeros((INPUT_SIZE, HIDDEN_PAD), jnp.bfloat16)
    w1p = w1p.at[:, :HIDDEN].set(w1.astype(jnp.bfloat16))
    b1p = jnp.zeros((1, HIDDEN_PAD), jnp.float32).at[:, :HIDDEN].set(b1)
    w2p = jnp.zeros((HIDDEN_PAD, OUT_PAD), jnp.float32)
    w2p = w2p.at[:HIDDEN, :NUM_CLASSES].set(w2)
    b2p = jnp.zeros((1, OUT_PAD), jnp.float32).at[:, :NUM_CLASSES].set(b2)
    return w1p, b1p, w2p, b2p


@functools.partial(jax.jit, static_argnames=("tb_max",))
def nn_forward(x, w1, b1, w2, b2, *, tb_max=TB_MAX):
    """x: [B, 784] f32. w1: [784,50], b1: [1,50], w2: [50,10], b2: [1,10]."""
    B = x.shape[0]
    assert x.shape[1] == INPUT_SIZE

    w1p, b1p, w2p, b2p = _prepare_params(w1, b1, w2, b2)

    # bf16 x: halves the dominant HBM traffic (x reads); f32 accumulation keeps
    # numerics effectively unchanged for this model.
    x_bf = x.astype(jnp.bfloat16)

    # Batch tile: multiple of 16 (bf16 sublane packing), capped at tb_max.
    TB = min(_round_up(tb_max, 16), _round_up(B, 16))
    Bp = _round_up(B, TB)
    if Bp != B:
        x_bf = jnp.pad(x_bf, ((0, Bp - B), (0, 0)))

    grid = (Bp // TB,)

    out_padded = pl.pallas_call(
        mlp_kernel,
        out_shape=jax.ShapeDtypeStruct((Bp, OUT_PAD), jnp.float32),
        grid_spec=pltpu.PrefetchScalarGridSpec(
            num_scalar_prefetch=0,
            grid=grid,
            in_specs=[
                # x: streamed per batch tile (double-buffered by Pallas).
                pl.BlockSpec((TB, INPUT_SIZE), lambda i: (i, 0)),
                # weights / biases: constant index map -> VMEM-resident.
                pl.BlockSpec((INPUT_SIZE, HIDDEN_PAD), lambda i: (0, 0)),
                pl.BlockSpec((1, HIDDEN_PAD), lambda i: (0, 0)),
                pl.BlockSpec((HIDDEN_PAD, OUT_PAD), lambda i: (0, 0)),
                pl.BlockSpec((1, OUT_PAD), lambda i: (0, 0)),
            ],
            out_specs=pl.BlockSpec((TB, OUT_PAD), lambda i: (i, 0)),
        ),
        compiler_params=pltpu.CompilerParams(
            dimension_semantics=("parallel",),      # megacore-shard batch axis
            vmem_limit_bytes=32 * 1024 * 1024,      # safe on v5e/v6e/v7x
        ),
    )(x_bf, w1p, b1p, w2p, b2p)

    # Strip batch padding and the zero-padded logit lanes.
    return out_padded[:B, :NUM_CLASSES]


def init_params(key):
    """Deterministic init mimicking PyTorch nn.Linear default (uniform +-1/sqrt(fan_in))."""
    k1, k2, k3, k4 = jax.random.split(key, 4)
    bound1 = 1.0 / (INPUT_SIZE ** 0.5)
    bound2 = 1.0 / (HIDDEN ** 0.5)
    w1 = jax.random.uniform(k1, (INPUT_SIZE, HIDDEN), jnp.float32, -bound1, bound1)
    b1 = jax.random.uniform(k2, (1, HIDDEN), jnp.float32, -bound1, bound1)
    w2 = jax.random.uniform(k3, (HIDDEN, NUM_CLASSES), jnp.float32, -bound2, bound2)
    b2 = jax.random.uniform(k4, (1, NUM_CLASSES), jnp.float32, -bound2, bound2)
    return w1, b1, w2, b2


def _reference(x, w1, b1, w2, b2):
    # Plain-JAX reference, with x/w1 rounded to bf16 exactly as the kernel does.
    xb = x.astype(jnp.bfloat16).astype(jnp.float32)
    w1b = w1.astype(jnp.bfloat16).astype(jnp.float32)
    return jnp.maximum(xb @ w1b + b1, 0.0) @ w2 + b2


if __name__ == "__main__":
    key = jax.random.PRNGKey(0)
    kx, kp = jax.random.split(key)

    w1, b1, w2, b2 = init_params(kp)

    # Small batch (exercises batch padding: 8 -> tile of 16).
    B = 8
    x = jax.random.normal(kx, (B, INPUT_SIZE), jnp.float32)
    out = jax.block_until_ready(nn_forward(x, w1, b1, w2, b2))
    ref = _reference(x, w1, b1, w2, b2)
    assert out.shape == (B, NUM_CLASSES)
    assert jnp.allclose(out, ref, atol=1e-3, rtol=1e-3), float(jnp.max(jnp.abs(out - ref)))

    # Larger batch with a small tile cap (exercises a multi-step grid).
    B2 = 400
    x2 = jax.random.normal(kx, (B2, INPUT_SIZE), jnp.float32)
    out2 = jax.block_until_ready(nn_forward(x2, w1, b1, w2, b2, tb_max=128))
    ref2 = _reference(x2, w1, b1, w2, b2)
    assert out2.shape == (B2, NUM_CLASSES)
    assert jnp.allclose(out2, ref2, atol=1e-3, rtol=1e-3), float(jnp.max(jnp.abs(out2 - ref2)))

    print("KERNEL_OK")
</pallas_src>

<mosaic_0001>
module attributes {stable_mosaic.version = 11 : i64} {
  func.func @mlp_kernel(%arg0: i32, %arg1: memref<16x784xbf16, #tpu.memory_space<vmem>>, %arg2: memref<784x128xbf16, #tpu.memory_space<vmem>>, %arg3: memref<1x128xf32, #tpu.memory_space<vmem>>, %arg4: memref<128x128xf32, #tpu.memory_space<vmem>>, %arg5: memref<1x128xf32, #tpu.memory_space<vmem>>, %arg6: memref<16x128xf32, #tpu.memory_space<vmem>>) attributes {dimension_semantics = [#tpu.dimension_semantics<parallel>], iteration_bounds = array<i64: 1>, scalar_prefetch = 0 : i64, scratch_operands = 0 : i64, tpu.core_type = #tpu.core_type<tc>, window_params = [{transform_indices = @transform_0, window_bounds = array<i64: 16, 784>}, {pipeline_mode = #tpu.pipeline_mode<synchronous>, transform_indices = @transform_1, window_bounds = array<i64: 784, 128>}, {pipeline_mode = #tpu.pipeline_mode<synchronous>, transform_indices = @transform_2, window_bounds = array<i64: 1, 128>}, {pipeline_mode = #tpu.pipeline_mode<synchronous>, transform_indices = @transform_3, window_bounds = array<i64: 128, 128>}, {pipeline_mode = #tpu.pipeline_mode<synchronous>, transform_indices = @transform_4, window_bounds = array<i64: 1, 128>}, {transform_indices = @transform_5, window_bounds = array<i64: 16, 128>}]} {
    %c0 = arith.constant 0 : index
    %c0_0 = arith.constant 0 : index
    %0 = vector.load %arg1[%c0, %c0_0] : memref<16x784xbf16, #tpu.memory_space<vmem>>, vector<16x784xbf16>
    %c0_1 = arith.constant 0 : index
    %c0_2 = arith.constant 0 : index
    %1 = vector.load %arg2[%c0_1, %c0_2] : memref<784x128xbf16, #tpu.memory_space<vmem>>, vector<784x128xbf16>
    %cst = arith.constant dense<0.000000e+00> : vector<16x128xf32>
    %2 = tpu.matmul %0, %1, %cst {dimension_numbers = #tpu.dot_dimension_numbers<[1], [0], [0], [1], [0, 0, 1, 1], [], []>} : vector<16x784xbf16>, vector<784x128xbf16>, vector<16x128xf32> -> vector<16x128xf32>
    %c0_3 = arith.constant 0 : index
    %c0_4 = arith.constant 0 : index
    %3 = vector.load %arg3[%c0_3, %c0_4] : memref<1x128xf32, #tpu.memory_space<vmem>>, vector<1x128xf32>
    %4 = vector.broadcast %3 : vector<1x128xf32> to vector<16x128xf32>
    %5 = arith.addf %2, %4 : vector<16x128xf32>
    %cst_5 = arith.constant 0.000000e+00 : f32
    %6 = vector.broadcast %cst_5 : f32 to vector<16x128xf32>
    %7 = arith.maximumf %5, %6 : vector<16x128xf32>
    %c0_6 = arith.constant 0 : index
    %c0_7 = arith.constant 0 : index
    %8 = vector.load %arg4[%c0_6, %c0_7] : memref<128x128xf32, #tpu.memory_space<vmem>>, vector<128x128xf32>
    %cst_8 = arith.constant dense<0.000000e+00> : vector<16x128xf32>
    %9 = tpu.matmul %7, %8, %cst_8 {dimension_numbers = #tpu.dot_dimension_numbers<[1], [0], [0], [1], [0, 0, 1, 1], [], []>} : vector<16x128xf32>, vector<128x128xf32>, vector<16x128xf32> -> vector<16x128xf32>
    %c0_9 = arith.constant 0 : index
    %c0_10 = arith.constant 0 : index
    %10 = vector.load %arg5[%c0_9, %c0_10] : memref<1x128xf32, #tpu.memory_space<vmem>>, vector<1x128xf32>
    %11 = vector.broadcast %10 : vector<1x128xf32> to vector<16x128xf32>
    %12 = arith.addf %9, %11 : vector<16x128xf32>
    %c0_11 = arith.constant 0 : index
    %c0_12 = arith.constant 0 : index
    %13 = vector.load %arg6[%c0_11, %c0_12] : memref<16x128xf32, #tpu.memory_space<vmem>>, vector<16x128xf32>
    tpu.vector_store %arg6[%c0_11, %c0_12], %12 {strides = array<i32>} : memref<16x128xf32, #tpu.memory_space<vmem>>, vector<16x128xf32>,
    return
  }
  func.func @transform_0(%arg0: i32) -> (i32, i32) {
    %c0_i32 = arith.constant 0 : i32
    %c0_i32_0 = arith.constant 0 : i32
    return %arg0, %c0_i32 : i32, i32
  }
  func.func @transform_1(%arg0: i32) -> (i32, i32) {
    %c0_i32 = arith.constant 0 : i32
    %c0_i32_0 = arith.constant 0 : i32
    %c0_i32_1 = arith.constant 0 : i32
    return %c0_i32, %c0_i32_0 : i32, i32
  }
  func.func @transform_2(%arg0: i32) -> (i32, i32) {
    %c0_i32 = arith.constant 0 : i32
    %c0_i32_0 = arith.constant 0 : i32
    %c0_i32_1 = arith.constant 0 : i32
    return %c0_i32, %c0_i32_0 : i32, i32
  }
  func.func @transform_3(%arg0: i32) -> (i32, i32) {
    %c0_i32 = arith.constant 0 : i32
    %c0_i32_0 = arith.constant 0 : i32
    %c0_i32_1 = arith.constant 0 : i32
    return %c0_i32, %c0_i32_0 : i32, i32
  }
  func.func @transform_4(%arg0: i32) -> (i32, i32) {
    %c0_i32 = arith.constant 0 : i32
    %c0_i32_0 = arith.constant 0 : i32
    %c0_i32_1 = arith.constant 0 : i32
    return %c0_i32, %c0_i32_0 : i32, i32
  }
  func.func @transform_5(%arg0: i32) -> (i32, i32) {
    %c0_i32 = arith.constant 0 : i32
    %c0_i32_0 = arith.constant 0 : i32
    return %arg0, %c0_i32 : i32, i32
  }
}

</mosaic_0001>

<bundles_post_ra>
// kernel: nn_forward.1
= control target key start
LH: loop header
LB: loop body
LE: loop exit
PB: predicated region body
PF: predicated region fallthrough
CT: control target
= control target key end

     0   :  { %v1016_v38 = vmov 0.0   ;;  %vm1017_vm0 = vmmov 0   ;;  %vm463_vm1 = vcmask 130048   ;;  %s1276_s1 = inlined_call_operand.vmem [shape: bf16[784,128], index: 1, kind: input, shape index: {}]   ;;  %s1277_s0 = inlined_call_operand.vmem [shape: bf16[16,784], index: 0, kind: input, shape index: {}]   ;;  %s1278_s3 = inlined_call_operand.vmem [shape: f32[128,128], index: 3, kind: input, shape index: {}]   ;;  %s1279_s2 = inlined_call_operand.vmem [shape: f32[1,128], index: 2, kind: input, shape index: {}]   ;;  %s1280_s4 = inlined_call_operand.vmem [shape: f32[1,128], index: 4, kind: input, shape index: {}]   ;;  %s1281_s5 = inlined_call_operand.vmem [shape: f32[16,128], index: 5, kind: output, shape index: {}]  }
   0x1   :  { %v957_v0 = vld [vmem:[%s1276_s1 + $0x40] sm:$0xff]   ;;  %v961_v4 = vld [vmem:[%s1276_s1 + $0x48] sm:$0xff]   ;;  %v965_v8 = vld [vmem:[%s1276_s1 + $0x50] sm:$0xff]  }
   0x2   :  { %v958_v1 = vld [vmem:[%s1276_s1] sm:$0xff]   ;;  %796 = vmatprep.subr.bf16.mxu0 %v957_v0  ;;  %v962_v5 = vld [vmem:[%s1276_s1 + $0x8] sm:$0xff]   ;;  %v966_v9 = vld [vmem:[%s1276_s1 + $0x10] sm:$0xff]  }
   0x3   :  { %v959_v2 = vld [vmem:[%s1276_s1 + $0xc0] sm:$0xff]   ;;  %797 = vmatpush3.bf16.msra.mxu0 %v958_v1  ;;  %v963_v6 = vld [vmem:[%s1276_s1 + $0xc8] sm:$0xff]   ;;  %v967_v10 = vld [vmem:[%s1276_s1 + $0xd0] sm:$0xff]  }
   0x4   :  { %v960_v3 = vld [vmem:[%s1276_s1 + $0x80] sm:$0xff]   ;;  %818 = vmatprep.subr.bf16.mxu1 %v959_v2  ;;  %798 = vmatprep.subr.bf16.mxu0 %v961_v4  ;;  %v964_v7 = vld [vmem:[%s1276_s1 + $0x88] sm:$0xff]   ;;  %v968_v11 = vld [vmem:[%s1276_s1 + $0x90] sm:$0xff]  }
   0x5   :  { %819 = vmatpush3.bf16.msra.mxu1 %v960_v3  ;;  %v969_v12 = vld [vmem:[%s1276_s1 + $0x58] sm:$0xff]   ;;  %v973_v16 = vld [vmem:[%s1276_s1 + $0x60] sm:$0xff]   ;;  %v977_v20 = vld [vmem:[%s1276_s1 + $0x68] sm:$0xff]  }
   0x6   :  { %820 = vmatprep.subr.bf16.mxu1 %v963_v6  ;;  %v970_v13 = vld [vmem:[%s1276_s1 + $0x18] sm:$0xff]   ;;  %v974_v17 = vld [vmem:[%s1276_s1 + $0x20] sm:$0xff]   ;;  %v978_v21 = vld [vmem:[%s1276_s1 + $0x28] sm:$0xff]  }
   0x7   :  { %799 = vmatpush3.bf16.msra.mxu0 %v962_v5  ;;  %v971_v14 = vld [vmem:[%s1276_s1 + $0xd8] sm:$0xff]   ;;  %v975_v18 = vld [vmem:[%s1276_s1 + $0xe0] sm:$0xff]   ;;  %v979_v22 = vld [vmem:[%s1276_s1 + $0xe8] sm:$0xff]  }
   0x8   :  { %800 = vmatprep.subr.bf16.mxu0 %v965_v8  ;;  %v972_v15 = vld [vmem:[%s1276_s1 + $0x98] sm:$0xff]   ;;  %v976_v19 = vld [vmem:[%s1276_s1 + $0xa0] sm:$0xff]   ;;  %v980_v23 = vld [vmem:[%s1276_s1 + $0xa8] sm:$0xff]  }
   0x9   :  { %821 = vmatpush3.bf16.msra.mxu1 %v964_v7  ;;  %v981_v24 = vld [vmem:[%s1276_s1 + $0x70] sm:$0xff]   ;;  %v985_v28 = vld [vmem:[%s1276_s1 + $0x78] sm:$0xff]   ;;  %v990_v32 = vld [vmem:[%s1277_s0 + $0x4] ss:$28 sps:$4 sm:$0xff]  }
   0xa   :  { %822 = vmatprep.subr.bf16.mxu1 %v967_v10  ;;  %v982_v25 = vld [vmem:[%s1276_s1 + $0x30] sm:$0xff]   ;;  %v986_v29 = vld [vmem:[%s1276_s1 + $0x38] sm:$0xff]   ;;  %499 = vmatprep.mubr.bf16.mxu0 %v990_v32  ;;  %v992_v34 = vld [vmem:[%s1276_s1 + $0x140] sm:$0xff]  }
   0xb   :  { %801 = vmatpush3.bf16.msra.mxu0 %v966_v9  ;;  %v983_v26 = vld [vmem:[%s1276_s1 + $0xf0] sm:$0xff]   ;;  %v987_v30 = vld [vmem:[%s1276_s1 + $0xf8] sm:$0xff]   ;;  %v993_v35 = vld [vmem:[%s1277_s0 + $0x8] ss:$28 sps:$4 sm:$0xff]  }
   0xc   :  { %802 = vmatprep.subr.bf16.mxu0 %v969_v12  ;;  %v984_v27 = vld [vmem:[%s1276_s1 + $0xb0] sm:$0xff]   ;;  %v988_v31 = vld [vmem:[%s1277_s0] ss:$28 sps:$4 sm:$0xff]   ;;  %v995_v36 = vld [vmem:[%s1277_s0 + $0xc] ss:$28 sps:$4 sm:$0xff]  }
   0xd   :  { %823 = vmatpush3.bf16.msra.mxu1 %v968_v11  ;;  %v991_v33 = vld [vmem:[%s1276_s1 + $0xb8] sm:$0xff]   ;;  %v996_v37 = vld [vmem:[%s1276_s1 + $0x100] sm:$0xff]   ;;  %540 = vmatprep.mubr.bf16.mxu1 %v995_v36  ;;  %v997_v39 = vld [vmem:[%s1276_s1 + $0x148] sm:$0xff]  }
   0xe   :  { %824 = vmatprep.subr.bf16.mxu1 %v971_v14  ;;  %v998_v40 = vld [vmem:[%s1276_s1 + $0x108] sm:$0xff]   ;;  %v999_v41 = vld [vmem:[%s1276_s1 + $0x150] sm:$0xff]   ;;  %v1001_v43 = vld [vmem:[%s1276_s1 + $0x158] sm:$0xff]  }
   0xf   :  { %803 = vmatpush3.bf16.msra.mxu0 %v970_v13  ;;  %v1000_v42 = vld [vmem:[%s1276_s1 + $0x110] sm:$0xff]   ;;  %v1002_v44 = vld [vmem:[%s1276_s1 + $0x118] sm:$0xff]   ;;  %v1003_v45 = vld [vmem:[%s1276_s1 + $0x160] sm:$0xff]  }
  0x10   :  { %804 = vmatprep.subr.bf16.mxu0 %v973_v16  ;;  %v1004_v46 = vld [vmem:[%s1276_s1 + $0x120] sm:$0xff]   ;;  %v1005_v47 = vld [vmem:[%s1276_s1 + $0x168] sm:$0xff]   ;;  %v1014_v49 = vld [vmem:[%s1277_s0 + $0x14] ss:$28 sps:$4 sm:$0xff]  }
  0x11   :  { %825 = vmatpush3.bf16.msra.mxu1 %v972_v15  ;;  %v1011_v48 = vld [vmem:[%s1276_s1 + $0x180] sm:$0xff]   ;;  %v1015_v50 = vld [vmem:[%s1277_s0 + $0x18] ss:$28 sps:$4 sm:$0xff]   ;;  %v1006_v51 = vld [vmem:[%s1276_s1 + $0x128] sm:$0xff]  }
  0x12   :  { %826 = vmatprep.subr.bf16.mxu1 %v975_v18  ;;  %v1007_v52 = vld [vmem:[%s1276_s1 + $0x170] sm:$0xff]   ;;  %v1009_v54 = vld [vmem:[%s1276_s1 + $0x178] sm:$0xff]   ;;  %v633_v57 = vld [vmem:[%s1278_s3] sm:$0xff] }
  0x13   :  { %805 = vmatpush3.bf16.msra.mxu0 %v974_v17  ;;  %v1008_v53 = vld [vmem:[%s1276_s1 + $0x130] sm:$0xff]   ;;  %v1010_v55 = vld [vmem:[%s1276_s1 + $0x138] sm:$0xff]   ;;  %v634_v58 = vld [vmem:[%s1278_s3 + $0x8] sm:$0xff] }
  0x14   :  { %806 = vmatprep.subr.bf16.mxu0 %v977_v20  ;;  %v1012_v56 = vld [vmem:[%s1277_s0 + $0x10] ss:$28 sps:$4 sm:$0xff]   ;;  %v923_v60 = vpack.c.bf16 %v634_v58, %v633_v57  ;;  %v636_v61 = vld [vmem:[%s1278_s3 + $0x18] sm:$0xff]  ;;  %v637_v63 = vld [vmem:[%s1278_s3 + $0x20] sm:$0xff] }
  0x15   :  { %827 = vmatpush3.bf16.msra.mxu1 %v976_v19  ;;  %v635_v59 = vld [vmem:[%s1278_s3 + $0x10] sm:$0xff]  ;;  %v638_v0 = vld [vmem:[%s1278_s3 + $0x28] sm:$0xff]  ;;  %v640_v3 = vld [vmem:[%s1278_s3 + $0x38] sm:$0xff] }
  0x16   :  { %828 = vmatprep.subr.bf16.mxu1 %v979_v22  ;;  %v927_v62 = vpack.c.bf16 %v636_v61, %v635_v59  ;;  %v931_v1 = vpack.c.bf16 %v638_v0, %v637_v63  ;;  %v639_v2 = vld [vmem:[%s1278_s3 + $0x30] sm:$0xff]  ;;  %v641_v5 = vld [vmem:[%s1278_s3 + $0x40] sm:$0xff]  ;;  %v642_v6 = vld [vmem:[%s1278_s3 + $0x48] sm:$0xff] }
  0x17   :  { %807 = vmatpush3.bf16.msra.mxu0 %v978_v21  ;;  %v935_v4 = vpack.c.bf16 %v640_v3, %v639_v2  ;;  %v939_v7 = vpack.c.bf16 %v642_v6, %v641_v5  ;;  %v643_v8 = vld [vmem:[%s1278_s3 + $0x50] sm:$0xff]  ;;  %v644_v9 = vld [vmem:[%s1278_s3 + $0x58] sm:$0xff]  ;;  %v645_v11 = vld [vmem:[%s1278_s3 + $0x60] sm:$0xff] }
  0x18   :  { %808 = vmatprep.subr.bf16.mxu0 %v981_v24  ;;  %v943_v10 = vpack.c.bf16 %v644_v9, %v643_v8  ;;  %v646_v12 = vld [vmem:[%s1278_s3 + $0x68] sm:$0xff]  ;;  %v647_v14 = vld [vmem:[%s1278_s3 + $0x70] sm:$0xff]  ;;  %v648_v15 = vld [vmem:[%s1278_s3 + $0x78] sm:$0xff] }
  0x19   :  { %829 = vmatpush3.bf16.msra.mxu1 %v980_v23  ;;  %v947_v13 = vpack.c.bf16 %v646_v12, %v645_v11  ;;  %v951_v16 = vpack.c.bf16 %v648_v15, %v647_v14  ;;  %v737_v18 = vld [vmem:[%s1279_s2] ss:$0 sm:$0xff] }
  0x1a   :  { %830 = vmatprep.subr.bf16.mxu1 %v983_v26 }
  0x1b   :  { %809 = vmatpush3.bf16.msra.mxu0 %v982_v25 }
  0x1c   :  { %810 = vmatprep.subr.bf16.mxu0 %v985_v28 }
  0x1d   :  { %831 = vmatpush3.bf16.msra.mxu1 %v984_v27 }
  0x1e   :  { %832 = vmatprep.subr.bf16.mxu1 %v987_v30 }
  0x1f   :  { %811 = vmatpush3.bf16.msra.mxu0 %v986_v29 }
  0x20   :  { %840 = vmatprep.subr.bf16.mxu0 %v992_v34 }
  0x21   :  { %833 = vmatpush3.bf16.msra.mxu1 %v991_v33 }
  0x22   :  { %500 = vmatmul.mubr.bf16.vlgmr.msra.gmra.mrb[0].mxu0 %v988_v31  ;;  %882 = vmatprep.subr.bf16.mxu1 %v1016_v38 }
  0x23   :  { %841 = vmatpush3.bf16.msra.mxu0 %v996_v37  ;;  %581 = vmatprep.mubr.bf16.mxu0 %v1014_v49 }
  0x24   :  { %541 = vmatmul.mubr.bf16.vlgmr.msra.gmra.mrb[0].mxu1 %v993_v35  ;;  %842 = vmatprep.subr.bf16.mxu0 %v997_v39 }
  0x25   :  { %884 = vmatprep.mubr.msk.bf16.mxu1 %vm1017_vm0, %v1016_v38  ;;  %883 = vmatpush3.bf16.msra.mxu1 %v1011_v48 }
  0x26   :  { %924 = vmatprep.subr.bf16.mxu1 %v923_v60 }
  0x27   :  { %843 = vmatpush3.bf16.msra.mxu0 %v998_v40 }
  0x28   :  { %844 = vmatprep.subr.bf16.mxu0 %v999_v41 }
  0x2b   :  { %845 = vmatpush3.bf16.msra.mxu0 %v1000_v42 }
  0x2c   :  { %846 = vmatprep.subr.bf16.mxu0 %v1001_v43  ;;  %885 = vmatmul.mubr.msk.bf16.vlgmr.msra.gmra.mrb[4].mxu1 %vm463_vm1, %v1015_v50  ;;  %v795_v50 = vld [vmem:[%s1280_s4] ss:$0 sm:$0xff] }
  0x2d   :  { %926 = vmatpush3.bf16.msra.mxu1 %v923_v60 }
  0x2e   :  { %928 = vmatprep.subr.bf16.mxu1 %v927_v62 }
  0x2f   :  { %847 = vmatpush3.bf16.msra.mxu0 %v1002_v44 }
  0x30   :  { %848 = vmatprep.subr.bf16.mxu0 %v1003_v45 }
  0x31   :  { %930 = vmatpush3.bf16.msra.mxu1 %v927_v62 }
  0x32   :  { %932 = vmatprep.subr.bf16.mxu1 %v931_v1 }
  0x33   :  { %849 = vmatpush3.bf16.msra.mxu0 %v1004_v46 }
  0x34   :  { %850 = vmatprep.subr.bf16.mxu0 %v1005_v47 }
  0x35   :  { %934 = vmatpush3.bf16.msra.mxu1 %v931_v1 }
  0x36   :  { %936 = vmatprep.subr.bf16.mxu1 %v935_v4 }
  0x37   :  { %851 = vmatpush3.bf16.msra.mxu0 %v1006_v51 }
  0x38   :  { %852 = vmatprep.subr.bf16.mxu0 %v1007_v52 }
  0x39   :  { %938 = vmatpush3.bf16.msra.mxu1 %v935_v4 }
  0x3a   :  { %940 = vmatprep.subr.bf16.mxu1 %v939_v7 }
  0x3b   :  { %853 = vmatpush3.bf16.msra.mxu0 %v1008_v53 }
  0x3c   :  { %854 = vmatprep.subr.bf16.mxu0 %v1009_v54 }
  0x3d   :  { %942 = vmatpush3.bf16.msra.mxu1 %v939_v7 }
  0x3e   :  { %944 = vmatprep.subr.bf16.mxu1 %v943_v10 }
  0x3f   :  { %855 = vmatpush3.bf16.msra.mxu0 %v1010_v55 }
  0x41   :  { %946 = vmatpush3.bf16.msra.mxu1 %v943_v10 }
  0x42   :  { %582 = vmatmul.mubr.bf16.vlgmr.msra.gmra.mrb[4].mxu0 %v1012_v56  ;;  %948 = vmatprep.subr.bf16.mxu1 %v947_v13 }
  0x45   :  { %950 = vmatpush3.bf16.msra.mxu1 %v947_v13 }
  0x46   :  { %952 = vmatprep.subr.bf16.mxu1 %v951_v16 }
  0x49   :  { %954 = vmatpush3.bf16.msra.mxu1 %v951_v16 }
  0xf5   :  { %v812_v17 = vpop.f32.mrb[0].mxu0 }
  0xf6   :  { %v813_v19 = vpop.f32.mrb[1].mxu0 }
  0xf7   :  { %v814_v20 = vadd.f32 %v813_v19, %v812_v17  ;;  %v815_v21 = vpop.f32.mrb[2].mxu0  ;;  %v834_v22 = vpop.f32.mrb[0].mxu1 }
  0xf8   :  { %v816_v23 = vpop.f32.mrb[3].mxu0  ;;  %v835_v26 = vpop.f32.mrb[1].mxu1 }
  0xf9   :  { %v502_v24 = vadd.f32 %v814_v20, %v737_v18  ;;  %v817_v25 = vadd.f32 %v816_v23, %v815_v21  ;;  %v836_v27 = vadd.f32 %v835_v26, %v834_v22  ;;  %v837_v28 = vpop.f32.mrb[2].mxu1 }
  0xfa   :  { %v838_v30 = vpop.f32.mrb[3].mxu1 }
  0xfb   :  { %v505_v29 = vadd.f32 %v817_v25, %v737_v18  ;;  %v543_v31 = vadd.f32 %v836_v27, %v502_v24  ;;  %v839_v32 = vadd.f32 %v838_v30, %v837_v28 }
  0xfd   :  { %v546_v33 = vadd.f32 %v839_v32, %v505_v29 }
  0xff   :  { %v624_v34 = vpop.f32.mrb[4].mxu1 }
 0x100   :  { %v886_v35 = vpop.f32.mrb[5].mxu1 }
 0x101   :  { %v627_v36 = vpop.f32.mrb[6].mxu1 }
 0x102   :  { %v887_v37 = vpop.f32.mrb[7].mxu1 }
 0x115   :  { %v856_v38 = vpop.f32.mrb[4].mxu0 }
 0x116   :  { %v857_v39 = vpop.f32.mrb[5].mxu0 }
 0x117   :  { %v858_v40 = vadd.f32 %v857_v39, %v856_v38  ;;  %v859_v41 = vpop.f32.mrb[6].mxu0 }
 0x118   :  { %v860_v42 = vpop.f32.mrb[7].mxu0 }
 0x119   :  { %v584_v43 = vadd.f32 %v858_v40, %v543_v31  ;;  %v861_v44 = vadd.f32 %v860_v42, %v859_v41 }
 0x11b   :  { %v625_v45 = vadd.f32 %v624_v34, %v584_v43  ;;  %v587_v46 = vadd.f32 %v861_v44, %v546_v33 }
 0x11d   :  { %v631_v47 = vmax.f32 %v625_v45, 0.0  ;;  %v628_v48 = vadd.f32 %v627_v36, %v587_v46 }
 0x11f   :  { %v632_v49 = vmax.f32 %v628_v48, 0.0  ;;  %920 = vmatprep.mubr.f32.mxu1 %v631_v47 }
 0x121   :  { %921 = vmatmul.mubr.f32.vlgmr.msra.gmra.mrb[8].mxu1 %v632_v49 }
 0x1f4   :  { %v922_v51 = vpop.f32.mrb[8].mxu1 }
 0x1f5   :  { %v728_v52 = vadd.f32 %v922_v51, %v795_v50  ;;  %v722_v53 = vpop.f32.mrb[9].mxu1 }
 0x1f6   :  { %v723_v54 = vadd.f32 %v795_v50, %v722_v53 }
 0x1f7   :  { %732 = vst [vmem:[%s1281_s5 + $0x8] sm:$0xff] %v728_v52 }
 0x1f8   :  { %731 = vst [vmem:[%s1281_s5] sm:$0xff] %v723_v54 }

</bundles_post_ra>
